<compile_context>
chip_gen: v7x
topology: tpu7x:2x2x1
jax: 0.10.0
libtpu: 0.0.40
codegen_flags: <defaults>
</compile_context>

<pallas_src>
import jax
import jax.numpy as jnp
from jax.experimental import pallas as pl
from jax.experimental.pallas import tpu as pltpu


def _add_encoding_kernel(x_ref, enc_ref, o_ref):
    # Pure streaming add: vld, vld, vadd (VPU, broadcast over batch rows), vst.
    o_ref[...] = (x_ref[...] + enc_ref[...]).astype(o_ref.dtype)


def _vmem_capacity_bytes() -> int:
    """Trace-time VMEM capacity; conservative (v7x-sized) fallback."""
    try:
        return int(pltpu.get_tpu_info().vmem_capacity_bytes)
    except Exception:
        return 64 << 20


def _round_up(n: int, m: int) -> int:
    return ((n + m - 1) // m) * m


def random_encoding(x: jax.Array, encoding: jax.Array) -> jax.Array:
    """Pallas equivalent of RandomEncoding.forward: x + encoding[:, :x.shape[1]]."""
    B, S, E = x.shape
    assert encoding.ndim == 3 and encoding.shape[0] == 1 and encoding.shape[2] == E
    seq_size = encoding.shape[1]
    assert seq_size >= S, "sequence longer than the encoding parameter"

    L = S * E                       # flattened per-batch length actually used
    enc_len = seq_size * E          # flattened length of the full parameter
    out_dtype = jnp.result_type(x.dtype, encoding.dtype)  # PyTorch-style promotion

    # Free, contiguous collapses of the trailing dims -> lane-dense last axis.
    x2 = x.reshape(B, L)
    enc2 = encoding.reshape(1, enc_len)   # NOT sliced: index_map stays in [0, L)

    bytes_per = max(jnp.dtype(x.dtype).itemsize, jnp.dtype(out_dtype).itemsize)
    sub_mult = max(8, 32 // max(1, jnp.dtype(x.dtype).itemsize))  # 8 f32 / 16 bf16 / 32 i8

    # Generation-aware budgets (v5e/v6e: 128 MiB VMEM, v7x: 64 MiB per TC).
    vmem_cap = _vmem_capacity_bytes()
    if vmem_cap >= (100 << 20):
        max_tile_bytes = 8 << 20
        vmem_limit = 64 << 20
    else:
        max_tile_bytes = 4 << 20
        vmem_limit = 40 << 20

    # Batch tile: whole batch if small, else one sublane-pack worth of rows.
    Bt = B if B <= sub_mult else sub_mult

    # Lane tile: as large as the per-buffer budget allows, multiple of 128.
    lane_budget = max(128, (max_tile_bytes // (Bt * bytes_per)) // 128 * 128)
    if L <= lane_budget and (L % 128 == 0 or L == enc_len):
        Lt = L                                  # single lane-tile, layout-legal as full extent
    else:
        Lt = min(lane_budget, _round_up(L, 128))  # ragged tail handled by Pallas masking

    # Batch innermost so the encoding block index is constant across the batch
    # sweep and its HBM fetch is skipped for consecutive grid steps.
    grid = (pl.cdiv(L, Lt), pl.cdiv(B, Bt))

    x_spec = pl.BlockSpec((Bt, Lt), lambda l, b: (b, l))
    enc_spec = pl.BlockSpec((1, Lt), lambda l, b: (0, l))     # broadcast over batch
    out_spec = pl.BlockSpec((Bt, Lt), lambda l, b: (b, l))

    out2 = pl.pallas_call(
        _add_encoding_kernel,
        out_shape=jax.ShapeDtypeStruct((B, L), out_dtype),
        grid=grid,
        in_specs=[x_spec, enc_spec],
        out_specs=out_spec,
        compiler_params=pltpu.CompilerParams(
            dimension_semantics=("parallel", "parallel"),
            vmem_limit_bytes=vmem_limit,
        ),
    )(x2, enc2)

    return out2.reshape(B, S, E)


if __name__ == "__main__":
    # Module config: sequence_size=32, embedding_size=32; input uses S=16 <
    # sequence_size to exercise the encoding[:, :x.size(1)] slice semantics.
    B, S, E = 2, 16, 32
    SEQUENCE_SIZE = 32

    key = jax.random.PRNGKey(0)
    kx, ke = jax.random.split(key)
    x = jax.random.normal(kx, (B, S, E), dtype=jnp.float32)
    encoding = jax.random.normal(ke, (1, SEQUENCE_SIZE, E), dtype=jnp.float32)  # nn.Parameter

    out = random_encoding(x, encoding)
    out = jax.block_until_ready(out)

    ref = x + encoding[:, :S, :]
    assert out.shape == x.shape, (out.shape, x.shape)
    assert out.dtype == ref.dtype, (out.dtype, ref.dtype)
    assert jnp.allclose(out, ref, atol=1e-6, rtol=1e-6), "mismatch vs. reference"

    print("KERNEL_OK")
</pallas_src>

<mosaic_0001>
module attributes {stable_mosaic.version = 11 : i64} {
  func.func @_add_encoding_kernel(%arg0: i32, %arg1: i32, %arg2: memref<2x512xf32, #tpu.memory_space<vmem>>, %arg3: memref<1x512xf32, #tpu.memory_space<vmem>>, %arg4: memref<2x512xf32, #tpu.memory_space<vmem>>) attributes {dimension_semantics = [#tpu.dimension_semantics<parallel>, #tpu.dimension_semantics<parallel>], iteration_bounds = array<i64: 1, 1>, scalar_prefetch = 0 : i64, scratch_operands = 0 : i64, tpu.core_type = #tpu.core_type<tc>, window_params = [{transform_indices = @transform_0, window_bounds = array<i64: 2, 512>}, {transform_indices = @transform_1, window_bounds = array<i64: 1, 512>}, {transform_indices = @transform_2, window_bounds = array<i64: 2, 512>}]} {
    %c0 = arith.constant 0 : index
    %c0_0 = arith.constant 0 : index
    %0 = vector.load %arg2[%c0, %c0_0] : memref<2x512xf32, #tpu.memory_space<vmem>>, vector<2x512xf32>
    %c0_1 = arith.constant 0 : index
    %c0_2 = arith.constant 0 : index
    %1 = vector.load %arg3[%c0_1, %c0_2] : memref<1x512xf32, #tpu.memory_space<vmem>>, vector<1x512xf32>
    %2 = vector.broadcast %1 : vector<1x512xf32> to vector<2x512xf32>
    %3 = arith.addf %0, %2 : vector<2x512xf32>
    %c0_3 = arith.constant 0 : index
    %c0_4 = arith.constant 0 : index
    %4 = vector.load %arg4[%c0_3, %c0_4] : memref<2x512xf32, #tpu.memory_space<vmem>>, vector<2x512xf32>
    tpu.vector_store %arg4[%c0_3, %c0_4], %3 {strides = array<i32>} : memref<2x512xf32, #tpu.memory_space<vmem>>, vector<2x512xf32>,
    return
  }
  func.func @transform_0(%arg0: i32, %arg1: i32) -> (i32, i32) {
    %c0_i32 = arith.constant 0 : i32
    return %arg1, %arg0 : i32, i32
  }
  func.func @transform_1(%arg0: i32, %arg1: i32) -> (i32, i32) {
    %c0_i32 = arith.constant 0 : i32
    %c0_i32_0 = arith.constant 0 : i32
    return %c0_i32, %arg0 : i32, i32
  }
  func.func @transform_2(%arg0: i32, %arg1: i32) -> (i32, i32) {
    %c0_i32 = arith.constant 0 : i32
    return %arg1, %arg0 : i32, i32
  }
}

</mosaic_0001>

<bundles_post_ra>
// kernel: tpu_custom_call.1
= control target key start
LH: loop header
LB: loop body
LE: loop exit
PB: predicated region body
PF: predicated region fallthrough
CT: control target
= control target key end

     0   :  { %7 = vsyncpa [#allocation3], 0  ;;  %s232_s0 = inlined_call_operand.hbm [shape: f32[2,512], index: 0, kind: input, shape index: {}]   ;;  %s233_s1 = inlined_call_operand.hbm [shape: f32[1,1024], index: 1, kind: input, shape index: {}]   ;;  %s234_s2 = inlined_call_operand.hbm [shape: f32[2,512], index: 2, kind: output, shape index: {}]  }
   0x1   :  { %8 = vsyncpa [#allocation6], 0 }
   0x2   :  { %9 = vsyncpa [#allocation4], 0  ;;  %s167_s9 = smov [#allocation2]   ;;  %s168_s11 = smov [#allocation5]  }
   0x3   :  { %s16_s10 = sshll.u32 %s167_s9, 4  ;;  %s26_s12 = sshll.u32 %s168_s11, 4  ;;  %s17_s10 = int_to_ptr.vmem [resolvable:$true] %s16_s10  ;;  %s186_s12 = int_to_ptr.vmem [resolvable:$true] %s26_s12 }
   0x4   :  { %s95_s15 = scalar_lea.hbm %s232_s0, 128 }
   0x5   :  { %p96_p0 = scmp.ne.s32.totalorder %s232_s0, %s95_s15  ;;  %p99_p1 = scmp.lt.u32.totalorder %s95_s15, %s232_s0 }
   0x7   :  { %p101_p2 = pnand %p99_p1, %p96_p0 }
   0x9   :  { %104 = shalt.err (!%p101_p2)
}
   0xa   :  { %s105_s20 = scalar_lea.vmem %s17_s10, 128  ;;  %p110_p4 = scmp.lt.s32.totalorder %s17_s10, %s17_s10 }
   0xb   :  { %p106_p3 = scmp.ne.s32.totalorder %s17_s10, %s105_s20  ;;  %p111_p5 = scmp.lt.s32.totalorder %s105_s20, %s105_s20 }
   0xd   :  { %p112_p6 = por %p111_p5, %p110_p4 }
   0xf   :  { %p113_p7 = pnand %p112_p6, %p106_p3 }
  0x11   :  { %116 = shalt.err (!%p113_p7)
}
  0x12   :  { %19 = dma.hbm_to_vmem [thread:$0]  %s232_s0, 128, %s17_s10, [#allocation3]  }
  0x13   :  { %s117_s25 = scalar_lea.hbm %s233_s1, 64  ;;  %s119_s30 = scalar_lea.hbm %s233_s1, 128 }
  0x14   :  { %p118_p8 = scmp.ne.s32.totalorder %s233_s1, %s117_s25  ;;  %p120_p9 = scmp.lt.u32.totalorder %s119_s30, %s117_s25 }
  0x15   :  { %p121_p10 = scmp.lt.u32.totalorder %s117_s25, %s233_s1 }
  0x17   :  { %p122_p11 = por %p121_p10, %p120_p9 }
  0x19   :  { %p123_p12 = pnand %p122_p11, %p118_p8 }
  0x1b   :  { %126 = shalt.err (!%p123_p12)
}
  0x1c   :  { %s127_s0 = scalar_lea.vmem %s186_s12, 64  ;;  %p132_p0 = scmp.lt.s32.totalorder %s186_s12, %s186_s12 }
  0x1d   :  { %p128_p13 = scmp.ne.s32.totalorder %s186_s12, %s127_s0  ;;  %p133_p1 = scmp.lt.s32.totalorder %s127_s0, %s127_s0 }
  0x1f   :  { %p134_p2 = por %p133_p1, %p132_p0 }
  0x21   :  { %p135_p3 = pnand %p134_p2, %p128_p13 }
  0x23   :  { %138 = shalt.err (!%p135_p3)
}
  0x24   :  { %29 = dma.hbm_to_vmem [thread:$0]  %s233_s1, 64, %s186_s12, [#allocation6]  }
  0x25   :  { %161 = dma.done.wait [#allocation3], 128  }
  0x26   :  { %162 = vsyncadd [#allocation3], 4294967168 }
  0x27   :  { %163 = dma.done.wait [#allocation6], 64  }
  0x28   :  { %164 = vsyncadd [#allocation6], 4294967232  ;;  %v39_v0 = vlaneseq  ;;  %v169_v1 = vmov 1983009808   ;;  %v37_v9 = vld [vmem:[#allocation5] sm:$0xf] }
  0x29   :  { %v58_v2 = vunpack.c.l.s4 %v169_v1  ;;  %v36_v19 = vld [vmem:[#allocation2] sm:$0xff]  ;;  %s170_s1 = smov [#allocation7]  }
  0x2a   :  { %v40_v3 = vshrl.u32 %v39_v0, 7  ;;  %s81_s7 = sshll.u32 %s170_s1, 4  ;;  %s82_s7 = int_to_ptr.vmem [resolvable:$true] %s81_s7 }
  0x2b   :  { %v59_v4 = vunpack.c.0.s8 %v58_v2  ;;  %s139_s8 = scalar_lea.vmem %s82_s7, 128  ;;  %p144_p5 = scmp.lt.s32.totalorder %s82_s7, %s82_s7 }
  0x2c   :  { %v41_v5 = vsub.s32 0, %v40_v3  ;;  %v45_v6 = vsub.s32 1, %v40_v3  ;;  %v49_v7 = vsub.s32 2, %v40_v3  ;;  %v53_v8 = vsub.s32 3, %v40_v3  ;;  %p140_p4 = scmp.ne.s32.totalorder %s82_s7, %s139_s8  ;;  %p145_p6 = scmp.lt.s32.totalorder %s139_s8, %s139_s8 }
  0x2d   :  { %v62_v10 = vsub.s32 %v59_v4, %v40_v3 }
  0x2e   :  { %v42_v11 = vrot.slane %v37_v9, %v41_v5  ;;  %v46_v12 = vrot.slane %v37_v9, %v45_v6  ;;  %v50_v13 = vrot.slane %v37_v9, %v49_v7  ;;  %v54_v14 = vrot.slane %v37_v9, %v53_v8  ;;  %p146_p7 = por %p145_p6, %p144_p5 }
  0x30   :  { %v55_v15 = vcombine.low %v42_v11, %v46_v12  ;;  %v56_v16 = vcombine.low %v50_v13, %v54_v14  ;;  %p147_p8 = pnand %p146_p7, %p140_p4 }
  0x32   :  { %v63_v17 = vrot.slane %v55_v15, %v62_v10  ;;  %v70_v18 = vrot.slane %v56_v16, %v62_v10 }
  0x34   :  { %v71_v20 = vcombine.low %v63_v17, %v70_v18 }
  0x36   :  { %v73_v21 = vadd.f32 %v71_v20, %v36_v19 }
  0x38   :  { %74 = vst [vmem:[#allocation7] sm:$0xff] %v73_v21 }
  0x39   :  { %150 = shalt.err (!%p147_p8)
}
  0x3a   :  { %s151_s11 = scalar_lea.hbm %s234_s2, 128 }
  0x3b   :  { %p152_p9 = scmp.ne.s32.totalorder %s234_s2, %s151_s11  ;;  %p155_p10 = scmp.lt.u32.totalorder %s151_s11, %s234_s2 }
  0x3d   :  { %p157_p11 = pnand %p155_p10, %p152_p9 }
  0x3f   :  { %160 = shalt.err (!%p157_p11)
}
  0x40   :  { %84 = dma.vmem_to_hbm [thread:$0]  %s82_s7, 128, %s234_s2, [#allocation4]  }
  0x41   :  { %165 = dma.done.wait [#allocation4], 128  }
  0x42   :  { %166 = vsyncadd [#allocation4], 4294967168 }
  0x43   :  { %88 = vsyncpa [#allocation3], 1 }
  0x44   :  { %89 = vsyncpa [#allocation6], 1 }
  0x45   :  { %90 = vsyncpa [#allocation4], 1 }

</bundles_post_ra>
